<compile_context>
chip_gen: v6e
topology: v6e:2x2x1
jax: 0.10.0
libtpu: 0.0.40
codegen_flags: <defaults>
</compile_context>

<pallas_src>
import functools

import jax
import jax.numpy as jnp
from jax.experimental import pallas as pl
from jax.experimental.pallas import tpu as pltpu


def _round_up(x, m):
    return (x + m - 1) // m * m


def gvq_kernel(x_ref, wt_ref, b_ref, cbhi_ref, cblo_ref,
               out_ref, stats_ref,
               *, groups, vars_pad, tile_n, n_true, exact_tie_break):
    """Per-row-tile kernel.

    x_ref     : (tile_n, D)         bf16 input rows
    wt_ref    : (D, G*Vp)           bf16 projection weight (transposed, V padded to Vp)
    b_ref     : (1, G*Vp)           f32 bias (-1e9 on padded columns)
    cbhi_ref  : (G*Vp, G*var_dim)   bf16 block-diagonal codebook, high part
    cblo_ref  : (G*Vp, G*var_dim)   bf16 block-diagonal codebook, low (residual) part
    out_ref   : (tile_n, G*var_dim) quantized rows
    stats_ref : (1, 2*G*Vp)         [hard one-hot sums | softmax sums] for this tile
    """
    G, Vp, tn = groups, vars_pad, tile_n
    GVp = G * Vp

    # Row-validity mask for the padded tail tile (stats must use the true N).
    row0 = pl.program_id(0) * tn
    row_ids = jax.lax.broadcasted_iota(jnp.int32, (tn, 1), 0) + row0
    valid = (row_ids < n_true).astype(jnp.float32)                       # (tn, 1)

    # Projection on the MXU: bf16 x @ bf16 W^T -> f32 accum, + f32 bias.
    logits = jnp.dot(x_ref[...], wt_ref[...],
                     preferred_element_type=jnp.float32) + b_ref[...]    # (tn, G*Vp)

    iota_v = jax.lax.broadcasted_iota(jnp.int32, (tn, Vp), 1)
    hard_cols = []
    # Static unroll over groups; every slice below is 128-lane aligned.
    for g in range(G):
        lg = logits[:, g * Vp:(g + 1) * Vp]                              # (tn, Vp)
        row_max = jnp.max(lg, axis=-1, keepdims=True)                    # (tn, 1)

        if exact_tie_break:
            # First-index tie-break (matches torch.max); one extra cross-lane min.
            first_idx = jnp.min(jnp.where(lg == row_max, iota_v, Vp),
                                axis=-1, keepdims=True)                  # (tn, 1)
            hard = (iota_v == first_idx).astype(jnp.float32)
        else:
            hard = (lg == row_max).astype(jnp.float32)

        # Fold the row mask into `hard` once; reused by both the stats and the
        # quantize matmul (padded rows then produce zeros that are sliced off).
        hard = hard * valid                                              # (tn, Vp)

        # Softmax partial sums: mask + reciprocal fused into one (tn, 1) vector so
        # no full-size softmax temporary is kept.
        e = jnp.exp(lg - row_max)                                        # (tn, Vp)
        w = pl.reciprocal(jnp.sum(e, axis=-1, keepdims=True),
                          approx=True) * valid                           # (tn, 1)

        stats_ref[:, g * Vp:(g + 1) * Vp] = jnp.sum(hard, axis=0, keepdims=True)
        stats_ref[:, GVp + g * Vp:GVp + (g + 1) * Vp] = jnp.sum(
            e * w, axis=0, keepdims=True)
        hard_cols.append(hard)

    # Fused block-diagonal quantize matmul over all groups; two bf16 MXU passes with
    # an exact 0/1 LHS reproduce the f32 codebook values to ~2^-17 relative.
    hard_all = jnp.concatenate(hard_cols, axis=1).astype(jnp.bfloat16)   # (tn, G*Vp)
    acc = jnp.dot(hard_all, cbhi_ref[...], preferred_element_type=jnp.float32)
    acc = acc + jnp.dot(hard_all, cblo_ref[...], preferred_element_type=jnp.float32)
    out_ref[...] = acc.astype(out_ref.dtype)


def prepare_gvq_params(weight, bias, codebook, *, num_vars, groups):
    """One-time parameter layout prep. Cache the result per checkpoint, not per call.

    weight   : (G*V, D)  torch nn.Linear weight layout
    bias     : (G*V,)
    codebook : (1, G*V, var_dim)  torch `self.vars` layout
    """
    gv, D = weight.shape
    assert gv == groups * num_vars
    var_dim = codebook.shape[-1]

    Vp = _round_up(num_vars, 128)         # lane-align each group's codeword block
    GVp = groups * Vp

    w = weight.reshape(groups, num_vars, D).astype(jnp.float32)
    w = jnp.pad(w, ((0, 0), (0, Vp - num_vars), (0, 0)))                 # zero rows
    wt = jnp.transpose(w.reshape(GVp, D)).astype(jnp.bfloat16)           # (D, GVp)

    b = bias.reshape(groups, num_vars).astype(jnp.float32)
    b = jnp.pad(b, ((0, 0), (0, Vp - num_vars)), constant_values=-1e9)   # never argmax
    b = b.reshape(1, GVp)

    cb = codebook.reshape(groups, num_vars, var_dim).astype(jnp.float32)
    cb = jnp.pad(cb, ((0, 0), (0, Vp - num_vars), (0, 0)))               # (G, Vp, d)
    # Block-diagonal layout so every group quantizes with one fused matmul.
    cbd = jax.scipy.linalg.block_diag(*[cb[g] for g in range(groups)])   # (GVp, G*d)
    cb_hi = cbd.astype(jnp.bfloat16)
    cb_lo = (cbd - cb_hi.astype(jnp.float32)).astype(jnp.bfloat16)

    return dict(wt=wt, b=b, cb_hi=cb_hi, cb_lo=cb_lo,
                num_vars=num_vars, groups=groups, var_dim=var_dim,
                input_dim=D, vars_pad=Vp)


def gumbel_vector_quantizer_forward(x, params, *, curr_temp,
                                    tile_rows=256, out_dtype=jnp.float32,
                                    exact_tie_break=True):
    """Reproduces GumbelVectorQuantizer.forward (eval mode).

    x : (B, T, D) float32.  `params` is the output of prepare_gvq_params.
    """
    B, T, D = x.shape
    groups = params["groups"]
    num_vars = params["num_vars"]
    var_dim = params["var_dim"]
    Vp = params["vars_pad"]
    GVp = groups * Vp
    vq_dim = groups * var_dim
    N = B * T

    # Row tile: multiple of 8; 256 balances the two v7x TensorCores at wav2vec2 N
    # (raise toward 512-1024 on v6e which has one TC and 128 MiB VMEM).
    tn = min(_round_up(tile_rows, 8), _round_up(N, 8))
    N_pad = _round_up(N, tn)
    num_tiles = N_pad // tn

    x_flat = x.reshape(N, D).astype(jnp.float32)
    x_pad = jnp.pad(x_flat, ((0, N_pad - N), (0, 0))).astype(jnp.bfloat16)

    kernel = functools.partial(gvq_kernel, groups=groups, vars_pad=Vp,
                               tile_n=tn, n_true=N,
                               exact_tie_break=exact_tie_break)

    out, stats = pl.pallas_call(
        kernel,
        grid=(num_tiles,),
        in_specs=[
            pl.BlockSpec((tn, D), lambda i: (i, 0)),          # streamed rows
            pl.BlockSpec((D, GVp), lambda i: (0, 0)),         # resident weight
            pl.BlockSpec((1, GVp), lambda i: (0, 0)),         # resident bias
            pl.BlockSpec((GVp, vq_dim), lambda i: (0, 0)),    # resident codebook hi
            pl.BlockSpec((GVp, vq_dim), lambda i: (0, 0)),    # resident codebook lo
        ],
        out_specs=[
            pl.BlockSpec((tn, vq_dim), lambda i: (i, 0)),
            pl.BlockSpec((1, 2 * GVp), lambda i: (i, 0)),
        ],
        out_shape=[
            jax.ShapeDtypeStruct((N_pad, vq_dim), out_dtype),
            jax.ShapeDtypeStruct((num_tiles, 2 * GVp), jnp.float32),
        ],
        compiler_params=pltpu.CompilerParams(
            dimension_semantics=("parallel",),
            vmem_limit_bytes=48 * 1024 * 1024),
    )(x_pad, params["wt"], params["b"], params["cb_hi"], params["cb_lo"])

    # Tiny (tiles, 2*G*Vp) -> scalar finish in plain JAX glue, divided by TRUE N.
    sums = jnp.sum(stats, axis=0).reshape(2, groups, Vp)[:, :, :num_vars]
    hard_probs = sums[0] / N
    avg_probs = sums[1] / N
    code_perplexity = jnp.sum(
        jnp.exp(-jnp.sum(hard_probs * jnp.log(hard_probs + 1e-7), axis=-1)))
    prob_perplex = jnp.sum(
        jnp.exp(-jnp.sum(avg_probs * jnp.log(avg_probs + 1e-7), axis=-1)))

    return {
        "num_vars": num_vars * groups,
        "temp": curr_temp,
        "code_perplexity": code_perplexity,
        "prob_perplex": prob_perplex,
        "x": out[:N].reshape(B, T, vq_dim),
    }


if __name__ == "__main__":
    # Module config (small, consistent with the forward):
    #   input_dim=32, num_vars=16, temp=(2.0, 0.25, 0.999995), groups=2, vq_dim=16
    input_dim, num_vars, groups, vq_dim = 32, 16, 2, 16
    max_temp, min_temp, temp_decay = 2.0, 0.25, 0.999995
    var_dim = vq_dim // groups
    B, T = 2, 8

    key = jax.random.PRNGKey(0)
    k_x, k_w, k_v = jax.random.split(key, 3)

    # Deterministic parameter init mirroring the torch __init__:
    #   weight_proj.weight ~ N(0, 1), bias = 0, vars ~ U[0, 1)
    x = jax.random.uniform(k_x, (B, T, input_dim), dtype=jnp.float32)
    weight = jax.random.normal(k_w, (groups * num_vars, input_dim), dtype=jnp.float32)
    bias = jnp.zeros((groups * num_vars,), dtype=jnp.float32)
    codebook = jax.random.uniform(k_v, (1, groups * num_vars, var_dim), dtype=jnp.float32)

    params = prepare_gvq_params(weight, bias, codebook,
                                num_vars=num_vars, groups=groups)
    result = gumbel_vector_quantizer_forward(x, params, curr_temp=max_temp)

    jax.block_until_ready(result["x"])
    cp = jax.block_until_ready(result["code_perplexity"])
    pp = jax.block_until_ready(result["prob_perplex"])

    assert result["x"].shape == (B, T, vq_dim)
    assert result["num_vars"] == num_vars * groups
    assert bool(jnp.isfinite(cp)) and bool(jnp.isfinite(pp))
    print("KERNEL_OK")
</pallas_src>

<mosaic_0001>
module attributes {stable_mosaic.version = 11 : i64} {
  func.func @gvq_kernel(%arg0: i32, %arg1: memref<16x32xbf16, #tpu.memory_space<vmem>>, %arg2: memref<32x256xbf16, #tpu.memory_space<vmem>>, %arg3: memref<1x256xf32, #tpu.memory_space<vmem>>, %arg4: memref<256x16xbf16, #tpu.memory_space<vmem>>, %arg5: memref<256x16xbf16, #tpu.memory_space<vmem>>, %arg6: memref<16x16xf32, #tpu.memory_space<vmem>>, %arg7: memref<1x512xf32, #tpu.memory_space<vmem>>) attributes {dimension_semantics = [#tpu.dimension_semantics<parallel>], iteration_bounds = array<i64: 1>, scalar_prefetch = 0 : i64, scratch_operands = 0 : i64, tpu.core_type = #tpu.core_type<tc>, window_params = [{transform_indices = @transform_0, window_bounds = array<i64: 16, 32>}, {pipeline_mode = #tpu.pipeline_mode<synchronous>, transform_indices = @transform_1, window_bounds = array<i64: 32, 256>}, {pipeline_mode = #tpu.pipeline_mode<synchronous>, transform_indices = @transform_2, window_bounds = array<i64: 1, 256>}, {pipeline_mode = #tpu.pipeline_mode<synchronous>, transform_indices = @transform_3, window_bounds = array<i64: 256, 16>}, {pipeline_mode = #tpu.pipeline_mode<synchronous>, transform_indices = @transform_4, window_bounds = array<i64: 256, 16>}, {transform_indices = @transform_5, window_bounds = array<i64: 16, 16>}, {transform_indices = @transform_6, window_bounds = array<i64: 1, 512>}]} {
    %c16_i32 = arith.constant 16 : i32
    %0 = arith.muli %arg0, %c16_i32 : i32
    %1 = tpu.iota {dimensions = array<i32: 0>} : vector<16x1xi32>
    %2 = vector.broadcast %0 : i32 to vector<16x1xi32>
    %3 = arith.addi %1, %2 : vector<16x1xi32>
    %c16_i32_0 = arith.constant 16 : i32
    %4 = vector.broadcast %c16_i32_0 : i32 to vector<16x1xi32>
    %5 = arith.cmpi slt, %3, %4 : vector<16x1xi32>
    %6 = arith.extui %5 : vector<16x1xi1> to vector<16x1xi32>
    %7 = arith.sitofp %6 : vector<16x1xi32> to vector<16x1xf32>
    %c0 = arith.constant 0 : index
    %c0_1 = arith.constant 0 : index
    %8 = vector.load %arg1[%c0, %c0_1] : memref<16x32xbf16, #tpu.memory_space<vmem>>, vector<16x32xbf16>
    %c0_2 = arith.constant 0 : index
    %c0_3 = arith.constant 0 : index
    %9 = vector.load %arg2[%c0_2, %c0_3] : memref<32x256xbf16, #tpu.memory_space<vmem>>, vector<32x256xbf16>
    %cst = arith.constant dense<0.000000e+00> : vector<16x256xf32>
    %10 = tpu.matmul %8, %9, %cst {dimension_numbers = #tpu.dot_dimension_numbers<[1], [0], [0], [1], [0, 0, 1, 1], [], []>} : vector<16x32xbf16>, vector<32x256xbf16>, vector<16x256xf32> -> vector<16x256xf32>
    %c0_4 = arith.constant 0 : index
    %c0_5 = arith.constant 0 : index
    %11 = vector.load %arg3[%c0_4, %c0_5] : memref<1x256xf32, #tpu.memory_space<vmem>>, vector<1x256xf32>
    %12 = vector.broadcast %11 : vector<1x256xf32> to vector<16x256xf32>
    %13 = arith.addf %10, %12 : vector<16x256xf32>
    %14 = tpu.iota {dimensions = array<i32: 1>} : vector<16x128xi32>
    %15 = vector.extract_strided_slice %13 {offsets = [0, 0], sizes = [16, 128], strides = [1, 1]} : vector<16x256xf32> to vector<16x128xf32>
    %cst_6 = arith.constant dense<0xFF800000> : vector<16xf32>
    %16 = vector.multi_reduction <maximumf>, %15, %cst_6 [1] : vector<16x128xf32> to vector<16xf32>
    %17 = vector.shape_cast %16 : vector<16xf32> to vector<16x1xf32>
    %18 = vector.broadcast %17 : vector<16x1xf32> to vector<16x128xf32>
    %19 = arith.cmpf oeq, %15, %18 : vector<16x128xf32>
    %c128_i32 = arith.constant 128 : i32
    %20 = vector.broadcast %c128_i32 : i32 to vector<16x128xi32>
    %21 = arith.select %19, %14, %20 : vector<16x128xi1>, vector<16x128xi32>
    %cst_7 = arith.constant dense<2147483647> : vector<16xi32>
    %22 = vector.multi_reduction <minsi>, %21, %cst_7 [1] : vector<16x128xi32> to vector<16xi32>
    %23 = vector.shape_cast %22 : vector<16xi32> to vector<16x1xi32>
    %24 = vector.broadcast %23 : vector<16x1xi32> to vector<16x128xi32>
    %25 = arith.cmpi eq, %14, %24 : vector<16x128xi32>
    %26 = arith.extui %25 : vector<16x128xi1> to vector<16x128xi32>
    %27 = arith.sitofp %26 : vector<16x128xi32> to vector<16x128xf32>
    %28 = vector.broadcast %7 : vector<16x1xf32> to vector<16x128xf32>
    %29 = arith.mulf %27, %28 : vector<16x128xf32>
    %30 = vector.broadcast %17 : vector<16x1xf32> to vector<16x128xf32>
    %31 = arith.subf %15, %30 : vector<16x128xf32>
    %32 = math.exp %31 : vector<16x128xf32>
    %cst_8 = arith.constant dense<0.000000e+00> : vector<16xf32>
    %33 = vector.multi_reduction <add>, %32, %cst_8 [1] : vector<16x128xf32> to vector<16xf32>
    %34 = vector.shape_cast %33 : vector<16xf32> to vector<16x1xf32>
    %35 = tpu.reciprocal %34 {approx = true} : vector<16x1xf32> -> vector<16x1xf32>
    %36 = arith.mulf %35, %7 : vector<16x1xf32>
    %cst_9 = arith.constant dense<0.000000e+00> : vector<128xf32>
    %37 = vector.multi_reduction <add>, %29, %cst_9 [0] : vector<16x128xf32> to vector<128xf32>
    %38 = vector.shape_cast %37 : vector<128xf32> to vector<1x128xf32>
    %c0_10 = arith.constant 0 : index
    %c0_11 = arith.constant 0 : index
    %39 = vector.load %arg7[%c0_10, %c0_11] : memref<1x512xf32, #tpu.memory_space<vmem>>, vector<1x128xf32>
    tpu.vector_store %arg7[%c0_10, %c0_11], %38 {strides = array<i32>} : memref<1x512xf32, #tpu.memory_space<vmem>>, vector<1x128xf32>,
    %40 = vector.broadcast %36 : vector<16x1xf32> to vector<16x128xf32>
    %41 = arith.mulf %32, %40 : vector<16x128xf32>
    %cst_12 = arith.constant dense<0.000000e+00> : vector<128xf32>
    %42 = vector.multi_reduction <add>, %41, %cst_12 [0] : vector<16x128xf32> to vector<128xf32>
    %43 = vector.shape_cast %42 : vector<128xf32> to vector<1x128xf32>
    %c0_13 = arith.constant 0 : index
    %c256 = arith.constant 256 : index
    %44 = vector.load %arg7[%c0_13, %c256] : memref<1x512xf32, #tpu.memory_space<vmem>>, vector<1x128xf32>
    tpu.vector_store %arg7[%c0_13, %c256], %43 {strides = array<i32>} : memref<1x512xf32, #tpu.memory_space<vmem>>, vector<1x128xf32>,
    %45 = vector.extract_strided_slice %13 {offsets = [0, 128], sizes = [16, 128], strides = [1, 1]} : vector<16x256xf32> to vector<16x128xf32>
    %cst_14 = arith.constant dense<0xFF800000> : vector<16xf32>
    %46 = vector.multi_reduction <maximumf>, %45, %cst_14 [1] : vector<16x128xf32> to vector<16xf32>
    %47 = vector.shape_cast %46 : vector<16xf32> to vector<16x1xf32>
    %48 = vector.broadcast %47 : vector<16x1xf32> to vector<16x128xf32>
    %49 = arith.cmpf oeq, %45, %48 : vector<16x128xf32>
    %c128_i32_15 = arith.constant 128 : i32
    %50 = vector.broadcast %c128_i32_15 : i32 to vector<16x128xi32>
    %51 = arith.select %49, %14, %50 : vector<16x128xi1>, vector<16x128xi32>
    %cst_16 = arith.constant dense<2147483647> : vector<16xi32>
    %52 = vector.multi_reduction <minsi>, %51, %cst_16 [1] : vector<16x128xi32> to vector<16xi32>
    %53 = vector.shape_cast %52 : vector<16xi32> to vector<16x1xi32>
    %54 = vector.broadcast %53 : vector<16x1xi32> to vector<16x128xi32>
    %55 = arith.cmpi eq, %14, %54 : vector<16x128xi32>
    %56 = arith.extui %55 : vector<16x128xi1> to vector<16x128xi32>
    %57 = arith.sitofp %56 : vector<16x128xi32> to vector<16x128xf32>
    %58 = vector.broadcast %7 : vector<16x1xf32> to vector<16x128xf32>
    %59 = arith.mulf %57, %58 : vector<16x128xf32>
    %60 = vector.broadcast %47 : vector<16x1xf32> to vector<16x128xf32>
    %61 = arith.subf %45, %60 : vector<16x128xf32>
    %62 = math.exp %61 : vector<16x128xf32>
    %cst_17 = arith.constant dense<0.000000e+00> : vector<16xf32>
    %63 = vector.multi_reduction <add>, %62, %cst_17 [1] : vector<16x128xf32> to vector<16xf32>
    %64 = vector.shape_cast %63 : vector<16xf32> to vector<16x1xf32>
    %65 = tpu.reciprocal %64 {approx = true} : vector<16x1xf32> -> vector<16x1xf32>
    %66 = arith.mulf %65, %7 : vector<16x1xf32>
    %cst_18 = arith.constant dense<0.000000e+00> : vector<128xf32>
    %67 = vector.multi_reduction <add>, %59, %cst_18 [0] : vector<16x128xf32> to vector<128xf32>
    %68 = vector.shape_cast %67 : vector<128xf32> to vector<1x128xf32>
    %c0_19 = arith.constant 0 : index
    %c128 = arith.constant 128 : index
    %69 = vector.load %arg7[%c0_19, %c128] : memref<1x512xf32, #tpu.memory_space<vmem>>, vector<1x128xf32>
    tpu.vector_store %arg7[%c0_19, %c128], %68 {strides = array<i32>} : memref<1x512xf32, #tpu.memory_space<vmem>>, vector<1x128xf32>,
    %70 = vector.broadcast %66 : vector<16x1xf32> to vector<16x128xf32>
    %71 = arith.mulf %62, %70 : vector<16x128xf32>
    %cst_20 = arith.constant dense<0.000000e+00> : vector<128xf32>
    %72 = vector.multi_reduction <add>, %71, %cst_20 [0] : vector<16x128xf32> to vector<128xf32>
    %73 = vector.shape_cast %72 : vector<128xf32> to vector<1x128xf32>
    %c0_21 = arith.constant 0 : index
    %c384 = arith.constant 384 : index
    %74 = vector.load %arg7[%c0_21, %c384] : memref<1x512xf32, #tpu.memory_space<vmem>>, vector<1x128xf32>
    tpu.vector_store %arg7[%c0_21, %c384], %73 {strides = array<i32>} : memref<1x512xf32, #tpu.memory_space<vmem>>, vector<1x128xf32>,
    %75 = tpu.concatenate %29, %59 in 1 : vector<16x128xf32>, vector<16x128xf32> -> vector<16x256xf32>
    %76 = arith.truncf %75 : vector<16x256xf32> to vector<16x256xbf16>
    %c0_22 = arith.constant 0 : index
    %c0_23 = arith.constant 0 : index
    %77 = vector.load %arg4[%c0_22, %c0_23] : memref<256x16xbf16, #tpu.memory_space<vmem>>, vector<256x16xbf16>
    %cst_24 = arith.constant dense<0.000000e+00> : vector<16x16xf32>
    %78 = tpu.matmul %76, %77, %cst_24 {dimension_numbers = #tpu.dot_dimension_numbers<[1], [0], [0], [1], [0, 0, 1, 1], [], []>} : vector<16x256xbf16>, vector<256x16xbf16>, vector<16x16xf32> -> vector<16x16xf32>
    %c0_25 = arith.constant 0 : index
    %c0_26 = arith.constant 0 : index
    %79 = vector.load %arg5[%c0_25, %c0_26] : memref<256x16xbf16, #tpu.memory_space<vmem>>, vector<256x16xbf16>
    %cst_27 = arith.constant dense<0.000000e+00> : vector<16x16xf32>
    %80 = tpu.matmul %76, %79, %cst_27 {dimension_numbers = #tpu.dot_dimension_numbers<[1], [0], [0], [1], [0, 0, 1, 1], [], []>} : vector<16x256xbf16>, vector<256x16xbf16>, vector<16x16xf32> -> vector<16x16xf32>
    %81 = arith.addf %78, %80 : vector<16x16xf32>
    %c0_28 = arith.constant 0 : index
    %c0_29 = arith.constant 0 : index
    %82 = vector.load %arg6[%c0_28, %c0_29] : memref<16x16xf32, #tpu.memory_space<vmem>>, vector<16x16xf32>
    tpu.vector_store %arg6[%c0_28, %c0_29], %81 {strides = array<i32>} : memref<16x16xf32, #tpu.memory_space<vmem>>, vector<16x16xf32>,
    return
  }
  func.func @transform_0(%arg0: i32) -> (i32, i32) {
    %c0_i32 = arith.constant 0 : i32
    %c0_i32_0 = arith.constant 0 : i32
    return %arg0, %c0_i32 : i32, i32
  }
  func.func @transform_1(%arg0: i32) -> (i32, i32) {
    %c0_i32 = arith.constant 0 : i32
    %c0_i32_0 = arith.constant 0 : i32
    %c0_i32_1 = arith.constant 0 : i32
    return %c0_i32, %c0_i32_0 : i32, i32
  }
  func.func @transform_2(%arg0: i32) -> (i32, i32) {
    %c0_i32 = arith.constant 0 : i32
    %c0_i32_0 = arith.constant 0 : i32
    %c0_i32_1 = arith.constant 0 : i32
    return %c0_i32, %c0_i32_0 : i32, i32
  }
  func.func @transform_3(%arg0: i32) -> (i32, i32) {
    %c0_i32 = arith.constant 0 : i32
    %c0_i32_0 = arith.constant 0 : i32
    %c0_i32_1 = arith.constant 0 : i32
    return %c0_i32, %c0_i32_0 : i32, i32
  }
  func.func @transform_4(%arg0: i32) -> (i32, i32) {
    %c0_i32 = arith.constant 0 : i32
    %c0_i32_0 = arith.constant 0 : i32
    %c0_i32_1 = arith.constant 0 : i32
    return %c0_i32, %c0_i32_0 : i32, i32
  }
  func.func @transform_5(%arg0: i32) -> (i32, i32) {
    %c0_i32 = arith.constant 0 : i32
    %c0_i32_0 = arith.constant 0 : i32
    return %arg0, %c0_i32 : i32, i32
  }
  func.func @transform_6(%arg0: i32) -> (i32, i32) {
    %c0_i32 = arith.constant 0 : i32
    %c0_i32_0 = arith.constant 0 : i32
    return %arg0, %c0_i32 : i32, i32
  }
}

</mosaic_0001>

<bundles_post_ra>
// kernel: tpu_custom_call.1
= control target key start
LH: loop header
LB: loop body
LE: loop exit
PB: predicated region body
PF: predicated region fallthrough
CT: control target
= control target key end

     0   :  { %12 = vsyncpa [#allocation3], 0  ;;  %v859_v2 = vmov 0   ;;  %vm81_vm0 = vcmask 261120   ;;  %s1130_s0 = inlined_call_operand.vmem [shape: bf16[16,32], index: 0, kind: input, shape index: {}]   ;;  %s1131_s1 = inlined_call_operand.vmem [shape: bf16[32,256], index: 1, kind: input, shape index: {}]   ;;  %s1132_s2 = inlined_call_operand.vmem [shape: f32[1,256], index: 2, kind: input, shape index: {}]   ;;  %s1133_s3 = inlined_call_operand.vmem [shape: bf16[256,16], index: 3, kind: input, shape index: {}]   ;;  %s1134_s4 = inlined_call_operand.vmem [shape: bf16[256,16], index: 4, kind: input, shape index: {}]   ;;  %s1135_s5 = inlined_call_operand.hbm [shape: f32[16,16], index: 5, kind: output, shape index: {0}]   ;;  %s1136_s6 = inlined_call_operand.hbm [shape: f32[1,512], index: 6, kind: output, shape index: {1}]  }
   0x1   :  { %v760_v0 = vld [vmem:[%s1131_s1 + $0x14] ss:$8 sps:$4 sm:$0xff]   ;;  %v762_v1 = vld [vmem:[%s1131_s1 + $0x10] ss:$8 sps:$4 sm:$0xff]   ;;  %117 = vmatprep.mubr.bf16.mxu0 %v859_v2  ;;  %v763_v3 = vld [vmem:[%s1131_s1 + $0x4] ss:$8 sps:$4 sm:$0xff]  }
   0x2   :  { %97 = vmatprep.subr.bf16.mxu0 %v760_v0  ;;  %v765_v4 = vld [vmem:[%s1131_s1] ss:$8 sps:$4 sm:$0xff]  }
   0x3   :  { %98 = vmatpush1.bf16.msra.mxu0 %v762_v1  ;;  %v766_v5 = vld [vmem:[%s1130_s0] sm:$0xff]  }
   0x4   :  { %99 = vmatprep.subr.bf16.mxu0 %v763_v3 }
   0x7   :  { %100 = vmatpush1.bf16.msra.mxu0 %v765_v4 }
   0xa   :  { %664 = vmatmul.mubr.msk.bf16.vlgmr.msra.gmra.mxu0 %vm81_vm0, %v766_v5 }
   0xb   :  { %13 = vsyncpa [#allocation5], 0  ;;  %v46_v6 = vlaneseq  ;;  %v44_v9 = vld [vmem:[%s1132_s2] sm:$0x3]  ;;  %v767_v38 = vld [vmem:[%s1134_s4 + $0x78] sm:$0xff]  }
   0xc   :  { %v768_v39 = vld [vmem:[%s1133_s3 + $0x78] sm:$0xff]   ;;  %v771_v42 = vld [vmem:[%s1134_s4 + $0x70] sm:$0xff]   ;;  %709 = vmatprep.subr.bf16.mxu1 %v767_v38  ;;  %v775_v46 = vld [vmem:[%s1134_s4 + $0x68] sm:$0xff]  }
   0xd   :  { %v47_v7 = vshrl.u32 %v46_v6, 7  ;;  %v935_v22 = vand.u32 127, %v46_v6  ;;  %v769_v40 = vld [vmem:[%s1134_s4 + $0x38] sm:$0xff]   ;;  %v772_v43 = vld [vmem:[%s1133_s3 + $0x70] sm:$0xff]   ;;  %731 = vmatprep.subr.bf16.mxu0 %v768_v39  ;;  %v776_v47 = vld [vmem:[%s1133_s3 + $0x68] sm:$0xff]   ;;  %vm1108_vm15 = vcmp.lt.s32.totalorder %v46_v6, 128 }
   0xe   :  { %v770_v41 = vld [vmem:[%s1133_s3 + $0x38] sm:$0xff]   ;;  %710 = vmatpush3.bf16.msra.mxu1 %v769_v40  ;;  %v773_v44 = vld [vmem:[%s1134_s4 + $0x30] sm:$0xff]   ;;  %v777_v48 = vld [vmem:[%s1134_s4 + $0x28] sm:$0xff]  }
   0xf   :  { %v48_v8 = vsub.s32 0, %v47_v7  ;;  %v52_v10 = vsub.s32 1, %v47_v7  ;;  %732 = vmatpush3.bf16.msra.mxu0 %v770_v41  ;;  %v774_v45 = vld [vmem:[%s1133_s3 + $0x30] sm:$0xff]   ;;  %711 = vmatprep.subr.bf16.mxu1 %v771_v42  ;;  %v778_v49 = vld [vmem:[%s1133_s3 + $0x28] sm:$0xff]   ;;  %v779_v50 = vld [vmem:[%s1134_s4 + $0x60] sm:$0xff]  }
  0x10   :  { %733 = vmatprep.subr.bf16.mxu0 %v772_v43  ;;  %v780_v51 = vld [vmem:[%s1133_s3 + $0x60] sm:$0xff]   ;;  %v783_v54 = vld [vmem:[%s1134_s4 + $0x58] sm:$0xff]  }
  0x11   :  { %v49_v11 = vrot.slane %v44_v9, %v48_v8  ;;  %v53_v12 = vrot.slane %v44_v9, %v52_v10  ;;  %v781_v52 = vld [vmem:[%s1134_s4 + $0x20] sm:$0xff]   ;;  %v784_v55 = vld [vmem:[%s1133_s3 + $0x58] sm:$0xff]  }
  0x12   :  { %712 = vmatpush3.bf16.msra.mxu1 %v773_v44  ;;  %v782_v53 = vld [vmem:[%s1133_s3 + $0x20] sm:$0xff]   ;;  %v785_v56 = vld [vmem:[%s1134_s4 + $0x18] sm:$0xff]  }
  0x13   :  { %734 = vmatpush3.bf16.msra.mxu0 %v774_v45  ;;  %713 = vmatprep.subr.bf16.mxu1 %v775_v46  ;;  %v786_v57 = vld [vmem:[%s1133_s3 + $0x18] sm:$0xff]  }
  0x14   :  { %735 = vmatprep.subr.bf16.mxu0 %v776_v47 }
  0x16   :  { %714 = vmatpush3.bf16.msra.mxu1 %v777_v48 }
  0x17   :  { %736 = vmatpush3.bf16.msra.mxu0 %v778_v49  ;;  %715 = vmatprep.subr.bf16.mxu1 %v779_v50 }
  0x18   :  { %737 = vmatprep.subr.bf16.mxu0 %v780_v51 }
  0x1a   :  { %716 = vmatpush3.bf16.msra.mxu1 %v781_v52 }
  0x1b   :  { %738 = vmatpush3.bf16.msra.mxu0 %v782_v53  ;;  %717 = vmatprep.subr.bf16.mxu1 %v783_v54 }
  0x1c   :  { %739 = vmatprep.subr.bf16.mxu0 %v784_v55 }
  0x1e   :  { %718 = vmatpush3.bf16.msra.mxu1 %v785_v56  ;;  %v860_v56 = vmov 0.0  }
  0x1f   :  { %740 = vmatpush3.bf16.msra.mxu0 %v786_v57 }
  0xca   :  { %v119_v13 = vpop.f32.mrf.mxu0 }
  0xcb   :  { %v920_v14 = vadd.f32 %v119_v13, %v49_v11 }
  0xcc   :  { %v121_v15 = vpop.f32.mrf.mxu0 }
  0xcd   :  { %v922_v16 = vadd.f32 %v121_v15, %v53_v12  ;;  %130 = vmax.xlane.f32.xlu1 %v920_v14 }
  0xce   :  { %v123_v17 = vpop.f32.mrf.mxu0 }
  0xcf   :  { %v925_v18 = vadd.f32 %v123_v17, %v49_v11  ;;  %210 = vmax.xlane.f32.xlu0 %v922_v16 }
  0xd0   :  { %v125_v19 = vpop.f32.mrf.mxu0 }
  0xd1   :  { %v928_v20 = vadd.f32 %v125_v19, %v53_v12  ;;  %132 = vmax.xlane.f32.xlu1 %v925_v18 }
  0xd3   :  { %212 = vmax.xlane.f32.xlu0 %v928_v20 }
 0x156   :  { %v932_v21 = vpop.xlane.xlu1 %130 }
 0x157   :  { %vm134_vm1 = vcmp.eq.f32.partialorder %v920_v14, %v932_v21  ;;  %v174_v58 = vsub.f32 %v920_v14, %v932_v21 }
 0x158   :  { %v939_v23 = vpop.xlane.xlu0 %210  ;;  %v949_v26 = vsel %vm134_vm1, %v935_v22, 128 }
 0x159   :  { %vm214_vm2 = vcmp.eq.f32.partialorder %v922_v16, %v939_v23  ;;  %v139_v32 = vshra.s32 %v949_v26, 16  ;;  %v176_v60 = vmul.f32 1.442695, %v174_v58  ;;  %v254_v61 = vsub.f32 %v922_v16, %v939_v23  ;;  %v787_v23 = vld [vmem:[%s1134_s4 + $0x50] sm:$0xff]  }
 0x15a   :  { %v944_v24 = vsel %vm214_vm2, %v935_v22, 128  ;;  %v946_v25 = vpop.xlane.xlu1 %132  ;;  %v138_v7 = vand.u32 65535, %v949_v26  ;;  %v790_v26 = vld [vmem:[%s1133_s3 + $0x10] sm:$0xff]   ;;  %719 = vmatprep.subr.bf16.mxu1 %v787_v23 }
 0x15b   :  { %vm135_vm3 = vcmp.eq.f32.partialorder %v925_v18, %v946_v25  ;;  %v219_v28 = vshra.s32 %v944_v24, 16  ;;  %v972_v36 = vcvt.s32.f32 %v139_v32  ;;  %v175_v59 = vsub.f32 %v925_v18, %v946_v25  ;;  %v789_v25 = vld [vmem:[%s1134_s4 + $0x10] sm:$0xff]   ;;  %v795_v32 = vld [vmem:[%s1134_s4 + $0x40] sm:$0xff]  }
 0x15c   :  { %v953_v27 = vpop.xlane.xlu0 %212  ;;  %v959_v29 = vsel %vm135_vm3, %v935_v22, 128  ;;  %v218_v0 = vand.u32 65535, %v944_v24  ;;  %799 = vpow2.f32 %v176_v60  ;;  %v256_v1 = vmul.f32 1.442695, %v254_v61  ;;  %v788_v24 = vld [vmem:[%s1133_s3 + $0x50] sm:$0xff]   ;;  %720 = vmatpush3.bf16.msra.mxu1 %v789_v25 }
 0x15d   :  { %vm215_vm4 = vcmp.eq.f32.partialorder %v928_v20, %v953_v27  ;;  %v964_v31 = vcvt.s32.f32 %v219_v28  ;;  %v153_v35 = vshra.s32 %v959_v29, 16  ;;  %v178_v62 = vmul.f32 1.442695, %v175_v59  ;;  %741 = vmatprep.subr.bf16.mxu0 %v788_v24  ;;  %v791_v28 = vld [vmem:[%s1134_s4 + $0x48] sm:$0xff]  }
 0x15e   :  { %v962_v30 = vsel %vm215_vm4, %v935_v22, 128  ;;  %v255_v63 = vsub.f32 %v928_v20, %v953_v27  ;;  %v220_v5 = vcvt.s32.f32 %v218_v0  ;;  %v152_v11 = vand.u32 65535, %v959_v29  ;;  %742 = vmatpush3.bf16.msra.mxu0 %v790_v26  ;;  %v792_v29 = vld [vmem:[%s1133_s3 + $0x48] sm:$0xff]   ;;  %721 = vmatprep.subr.bf16.mxu1 %v791_v28 }
 0x15f   :  { %v233_v33 = vshra.s32 %v962_v30, 16  ;;  %222 = vmin.xlane.f32.xlu0 %v964_v31  ;;  %v976_v37 = vcvt.s32.f32 %v153_v35  ;;  %v232_v2 = vand.u32 65535, %v962_v30  ;;  %801 = vpow2.f32 %v178_v62  ;;  %v793_v30 = vld [vmem:[%s1134_s4 + $0x8] sm:$0xff]   ;;  %743 = vmatprep.subr.bf16.mxu0 %v792_v29  ;;  %v798_v35 = vld [vmem:[%s1133_s3] sm:$0xff]  }
 0x160   :  { %v258_v3 = vmul.f32 1.442695, %v255_v63  ;;  %803 = vpow2.f32 %v256_v1  ;;  %v140_v13 = vcvt.s32.f32 %v138_v7  ;;  %v154_v17 = vcvt.s32.f32 %v152_v11  ;;  %722 = vmatpush3.bf16.msra.mxu1 %v793_v30 }
 0x161   :  { %v969_v34 = vcvt.s32.f32 %v233_v33  ;;  %v234_v10 = vcvt.s32.f32 %v232_v2  ;;  %v796_v33 = vld [vmem:[%s1133_s3 + $0x40] sm:$0xff]   ;;  %723 = vmatprep.subr.bf16.mxu1 %v795_v32  ;;  %v861_v61 = vmov 1.0|1.0  }
 0x162   :  { %805 = vpow2.f32 %v258_v3 }
 0x163   :  { %236 = vmin.xlane.f32.xlu1 %v969_v34  ;;  %142 = vmin.xlane.f32.xlu0 %v972_v36 }
 0x167   :  { %156 = vmin.xlane.f32.xlu1 %v976_v37 }
 0x169   :  { %v1055_v19 = vpop.eup %799 }
 0x16c   :  { %v1058_v20 = vpop.eup %801 }
 0x16d   :  { %v1060_v21 = vpop.eup %803 }
 0x16f   :  { %v1076_v27 = vpop.eup %805 }
 0x1e8   :  { %v223_v4 = vpop.xlane.xlu0 %222 }
 0x1e9   :  { %vm224_vm5 = vcmp.eq.f32.partialorder %v964_v31, %v223_v4  ;;  %v794_v31 = vld [vmem:[%s1133_s3 + $0x8] sm:$0xff]   ;;  %s862_s3 = smov [#allocation4]  }
 0x1ea   :  { %v225_v8 = vsel %vm224_vm5, %v220_v5, inf  ;;  %744 = vmatpush3.bf16.msra.mxu0 %v794_v31 }
 0x1eb   :  { %226 = vmin.xlane.f32.xlu0 %v225_v8  ;;  %745 = vmatprep.subr.bf16.mxu0 %v796_v33 }
 0x1ec   :  { %v237_v9 = vpop.xlane.xlu1 %236  ;;  %v143_v12 = vpop.xlane.xlu0 %142 }
 0x1ed   :  { %vm238_vm6 = vcmp.eq.f32.partialorder %v969_v34, %v237_v9  ;;  %vm144_vm7 = vcmp.eq.f32.partialorder %v972_v36, %v143_v12  ;;  %v797_v34 = vld [vmem:[%s1134_s4] sm:$0xff]   ;;  %v229_v36 = vcvt.f32.s32 %v223_v4  ;;  %v149_v40 = vcvt.f32.s32 %v143_v12  ;;  %s647_s4 = sshll.u32 %s862_s3, 4  ;;  %s648_s4 = int_to_ptr.vmem [resolvable:$true] %s647_s4 }
 0x1ee   :  { %v239_v14 = vsel %vm238_vm6, %v234_v10, inf  ;;  %v145_v15 = vsel %vm144_vm7, %v140_v13, inf  ;;  %724 = vmatpush3.bf16.msra.mxu1 %v797_v34  ;;  %746 = vmatpush3.bf16.msra.mxu0 %v798_v35  ;;  %s815_s16 = scalar_lea.vmem %s648_s4, 64  ;;  %p820_p1 = scmp.lt.s32.totalorder %s648_s4, %s648_s4 }
 0x1ef   :  { %240 = vmin.xlane.f32.xlu1 %v239_v14  ;;  %146 = vmin.xlane.f32.xlu0 %v145_v15  ;;  %v230_v39 = vshll.u32 %v229_v36, 16  ;;  %v150_v48 = vshll.u32 %v149_v40, 16  ;;  %p816_p0 = scmp.ne.s32.totalorder %s648_s4, %s815_s16  ;;  %p821_p2 = scmp.lt.s32.totalorder %s815_s16, %s815_s16 }
 0x1f0   :  { %v157_v16 = vpop.xlane.xlu1 %156 }
 0x1f1   :  { %vm158_vm8 = vcmp.eq.f32.partialorder %v976_v37, %v157_v16  ;;  %v243_v37 = vcvt.f32.s32 %v237_v9  ;;  %v163_v45 = vcvt.f32.s32 %v157_v16  ;;  %p822_p3 = por %p821_p2, %p820_p1 }
 0x1f2   :  { %v159_v18 = vsel %vm158_vm8, %v154_v17, inf }
 0x1f3   :  { %160 = vmin.xlane.f32.xlu1 %v159_v18  ;;  %180 = vadd.xlane.f32.xlu0 %v1055_v19  ;;  %v244_v44 = vshll.u32 %v243_v37, 16  ;;  %v164_v53 = vshll.u32 %v163_v45, 16  ;;  %p823_p4 = pnand %p822_p3, %p816_p0 }
 0x1f7   :  { %182 = vadd.xlane.f32.xlu1 %v1058_v20  ;;  %260 = vadd.xlane.f32.xlu0 %v1060_v21 }
 0x1fb   :  { %262 = vadd.xlane.f32.xlu1 %v1076_v27 }
 0x274   :  { %v227_v38 = vpop.xlane.xlu0 %226 }
 0x275   :  { %v228_v41 = vcvt.f32.s32 %v227_v38 }
 0x277   :  { %v231_v42 = vadd.s32 %v230_v39, %v228_v41 }
 0x278   :  { %v241_v43 = vpop.xlane.xlu1 %240  ;;  %v147_v46 = vpop.xlane.xlu0 %146 }
 0x279   :  { %v242_v47 = vcvt.f32.s32 %v241_v43  ;;  %v148_v49 = vcvt.f32.s32 %v147_v46  ;;  %vm246_vm9 = vcmp.eq.s32.totalorder %v935_v22, %v231_v42 }
 0x27a   :  { %v667_v57 = vsel %vm246_vm9, 1.0, %v860_v56 }
 0x27b   :  { %v245_v50 = vadd.s32 %v244_v44, %v242_v47  ;;  %v151_v51 = vadd.s32 %v150_v48, %v148_v49 }
 0x27c   :  { %v161_v52 = vpop.xlane.xlu1 %160  ;;  %v181_v54 = vpop.xlane.xlu0 %180 }
 0x27d   :  { %v162_v55 = vcvt.f32.s32 %v161_v52  ;;  %vm247_vm10 = vcmp.eq.s32.totalorder %v935_v22, %v245_v50  ;;  %807 = vrcp.f32 %v181_v54  ;;  %vm166_vm12 = vcmp.eq.s32.totalorder %v935_v22, %v151_v51 }
 0x27e   :  { %v668_v58 = vsel %vm247_vm10, 1.0, %v860_v56  ;;  %vm685_vm11 = vmpackc.low %vm247_vm10, %vm246_vm9  ;;  %v665_v1 = vsel %vm166_vm12, 1.0, %v860_v56 }
 0x27f   :  { %v165_v59 = vadd.s32 %v164_v53, %v162_v55  ;;  %v268_v60 = vadd.f32 %v668_v58, %v667_v57  ;;  %686 = vmatprep.mubr.msk.bf16.mxu1 %vm685_vm11, %v861_v61  ;;  %706 = vmatprep.mubr.msk.bf16.mxu0 %vm685_vm11, %v861_v61 }
 0x280   :  { %v183_v62 = vpop.xlane.xlu1 %182  ;;  %v261_v0 = vpop.xlane.xlu0 %260 }
 0x281   :  { %v269_v63 = vrot.slane %v268_v60, 4  ;;  %809 = vrcp.f32 %v183_v62  ;;  %vm167_vm13 = vcmp.eq.s32.totalorder %v935_v22, %v165_v59 }
 0x282   :  { %v666_v2 = vsel %vm167_vm13, 1.0, %v860_v56  ;;  %vm687_vm14 = vmpackc.low %vm167_vm13, %vm166_vm12  ;;  %811 = vrcp.f32 %v261_v0 }
 0x283   :  { %v270_v3 = vadd.f32 %v269_v63, %v268_v60  ;;  %v188_v4 = vadd.f32 %v666_v2, %v665_v1  ;;  %688 = vmatmul.mubr.msk.bf16.vlgmr.msra.gmra.mxu1 %vm687_vm14, %v861_v61  ;;  %708 = vmatmul.mubr.msk.bf16.vlgmr.msra.gmra.mxu0 %vm687_vm14, %v861_v61 }
 0x284   :  { %v263_v5 = vpop.xlane.xlu1 %262 }
 0x285   :  { %v271_v7 = vrot.slane %v270_v3, 2  ;;  %v189_v8 = vrot.slane %v188_v4, 4  ;;  %813 = vrcp.f32 %v263_v5 }
 0x287   :  { %v272_v9 = vadd.f32 %v271_v7, %v270_v3  ;;  %v190_v10 = vadd.f32 %v189_v8, %v188_v4 }
 0x289   :  { %v273_v11 = vrot.slane %v272_v9, 1  ;;  %v191_v12 = vrot.slane %v190_v10, 2 }
 0x28a   :  { %v808_v15 = vpop.eup %807 }
 0x28b   :  { %v274_v22 = vadd.f32 %v273_v11, %v272_v9  ;;  %v192_v14 = vadd.f32 %v191_v12, %v190_v10  ;;  %v200_v18 = vmul.f32 %v808_v15, %v1055_v19 }
 0x28d   :  { %v193_v16 = vrot.slane %v192_v14, 1  ;;  %275 = vst.msk [vmem:[#allocation4 + $0x1] sm:$0x1] %vm1108_vm15, %v274_v22 }
 0x28e   :  { %v810_v17 = vpop.eup %809 }
 0x28f   :  { %v201_v23 = vmul.f32 %v810_v17, %v1058_v20  ;;  %v194_v24 = vadd.f32 %v193_v16, %v192_v14  ;;  %v812_v25 = vpop.eup %811 }
 0x290   :  { %v276_v28 = vmul.f32 %v812_v25, %v1060_v21 }
 0x291   :  { %199 = vst.msk [vmem:[#allocation4] sm:$0x1] %vm1108_vm15, %v194_v24  ;;  %v202_v6 = vadd.f32 %v201_v23, %v200_v18 }
 0x292   :  { %v814_v26 = vpop.eup %813 }
 0x293   :  { %v277_v29 = vmul.f32 %v814_v26, %v1076_v27  ;;  %v203_v30 = vrot.slane %v202_v6, 4 }
 0x295   :  { %v278_v31 = vadd.f32 %v277_v29, %v276_v28  ;;  %v204_v32 = vadd.f32 %v203_v30, %v202_v6 }
 0x297   :  { %v205_v33 = vrot.slane %v204_v32, 2  ;;  %v279_v34 = vrot.slane %v278_v31, 4 }
 0x299   :  { %v206_v35 = vadd.f32 %v205_v33, %v204_v32  ;;  %v280_v19 = vadd.f32 %v279_v34, %v278_v31 }
 0x29b   :  { %v207_v36 = vrot.slane %v206_v35, 1  ;;  %v281_v20 = vrot.slane %v280_v19, 2 }
 0x29d   :  { %v208_v37 = vadd.f32 %v207_v36, %v206_v35  ;;  %v282_v38 = vadd.f32 %v281_v20, %v280_v19 }
 0x29f   :  { %209 = vst.msk [vmem:[#allocation4 + $0x2] sm:$0x1] %vm1108_vm15, %v208_v37  ;;  %v283_v39 = vrot.slane %v282_v38, 1 }
 0x2a1   :  { %v284_v40 = vadd.f32 %v283_v39, %v282_v38 }
 0x2a3   :  { %285 = vst.msk [vmem:[#allocation4 + $0x3] sm:$0x1] %vm1108_vm15, %v284_v40 }
 0x2a4   :  { %826 = shalt.err (!%p823_p4)
}
 0x2a5   :  { %650 = dma.vmem_to_hbm [thread:$0]  %s648_s4, 64, %s1136_s6, [#allocation5]   ;;  %vm626_vm0 = vcmask 130048  }
 0x2a6   :  { %s863_s19 = smov [#allocation2]  }
 0x2a7   :  { %s634_s20 = sshll.u32 %s863_s19, 4  ;;  %s635_s20 = int_to_ptr.vmem [resolvable:$true] %s634_s20 }
 0x2a8   :  { %s835_s6 = scalar_lea.vmem %s635_s20, 256  ;;  %p840_p6 = scmp.lt.s32.totalorder %s635_s20, %s635_s20 }
 0x2a9   :  { %p836_p5 = scmp.ne.s32.totalorder %s635_s20, %s835_s6  ;;  %p841_p7 = scmp.lt.s32.totalorder %s835_s6, %s835_s6 }
 0x2ab   :  { %p842_p8 = por %p841_p7, %p840_p6 }
 0x2ad   :  { %p843_p9 = pnand %p842_p8, %p836_p5 }
 0x343   :  { %v725_v21 = vpop.f32.mrf.mxu1  ;;  %v747_v27 = vpop.f32.mrf.mxu0 }
 0x345   :  { %v726_v41 = vpop.f32.mrf.mxu1  ;;  %v748_v42 = vpop.f32.mrf.mxu0 }
 0x346   :  { %v727_v43 = vadd.f32 %v726_v41, %v725_v21  ;;  %v749_v44 = vadd.f32 %v748_v42, %v747_v27 }
 0x347   :  { %v728_v45 = vpop.f32.mrf.mxu1  ;;  %v750_v46 = vpop.f32.mrf.mxu0 }
 0x348   :  { %v620_v47 = vadd.f32 %v749_v44, %v727_v43 }
 0x349   :  { %v729_v48 = vpop.f32.mrf.mxu1  ;;  %v751_v49 = vpop.f32.mrf.mxu0 }
 0x34a   :  { %627 = vst.msk [vmem:[#allocation2] sm:$0xff] %vm626_vm0, %v620_v47  ;;  %v730_v50 = vadd.f32 %v729_v48, %v728_v45  ;;  %v752_v51 = vadd.f32 %v751_v49, %v750_v46 }
 0x34c   :  { %v623_v52 = vadd.f32 %v752_v51, %v730_v50 }
 0x34e   :  { %628 = vst.msk [vmem:[#allocation2 + $0x8] sm:$0xff] %vm626_vm0, %v623_v52 }
 0x34f   :  { %846 = shalt.err (!%p843_p9)
}
 0x350   :  { %s864_s21 = smov 128   ;;  %s865_s22 = smov 8  }
 0x351   :  { %640 = dma.vmem_to_hbm [thread:$0]  %s635_s20, 256, %s1135_s5, [#allocation3], %s864_s21, %s864_s21, %s865_s22  }
 0x352   :  { %855 = dma.done.wait [#allocation3], 256  }
 0x353   :  { %856 = vsyncadd [#allocation3], 4294967040 }
 0x354   :  { %857 = dma.done.wait [#allocation5], 64  }
 0x355   :  { %858 = vsyncadd [#allocation5], 4294967232 }
 0x356   :  { %657 = vsyncpa [#allocation3], 1 }
 0x357   :  { %658 = vsyncpa [#allocation5], 1 }

</bundles_post_ra>
